<compile_context>
chip_gen: v7x
topology: tpu7x:2x2x1
jax: 0.10.0
libtpu: 0.0.40
codegen_flags: <defaults>
</compile_context>

<pallas_src>
import functools

import jax
import jax.numpy as jnp
from jax.experimental import pallas as pl
from jax.experimental.pallas import tpu as pltpu


def _dice_bce_kernel(logits_ref, tgt_ref, bce_out_ref, inter_out_ref,
                     bce_acc, inter_acc, *, hw, needs_mask):
    i = pl.program_id(1)

    # Re-init the per-batch accumulators at the first spatial tile of each b.
    @pl.when(i == 0)
    def _():
        bce_acc[...] = jnp.zeros_like(bce_acc)
        inter_acc[...] = jnp.zeros_like(inter_acc)

    x = logits_ref[...].astype(jnp.float32)              # (C, R, 128)
    C, R, L = x.shape

    # Softmax over channels (axis 0 = outer axis -> pure elementwise VPU ops).
    m = jnp.max(x, axis=0, keepdims=True)                # (1, R, L)
    xm = x - m
    e = jnp.exp(xm)                                      # the only full-width exp
    s = jnp.sum(e, axis=0, keepdims=True)                # (1, R, L)
    logp = xm - jnp.log(s)                               # log-softmax
    p = e * (1.0 / s)                                    # softmax (exact divide, row only)

    tgt = tgt_ref[...]                                   # (1, R, L) int32 labels
    cls = jax.lax.broadcasted_iota(jnp.int32, (C, R, L), 0)
    t_mask = cls == tgt                                  # boolean one-hot (C, R, L)

    # PyTorch binary_cross_entropy clamps the log terms at -100.
    logp_c = jnp.maximum(logp, -100.0)
    log1mp_c = jnp.maximum(jnp.log1p(-p), -100.0)
    bce = -jnp.where(t_mask, logp_c, log1mp_c)           # (C, R, L)
    inter = jnp.where(t_mask, p, 0.0)                    # (C, R, L)

    # Per-step channel reduce (C-1 vector adds) -> C x smaller accumulators.
    bce_r = jnp.sum(bce, axis=0)                         # (R, L)
    inter_r = jnp.sum(inter, axis=0)                     # (R, L)

    if needs_mask:
        # Zero contributions from positions past the true H*W extent (boundary
        # blocks may contain undefined data).  Applied before accumulation.
        row = jax.lax.broadcasted_iota(jnp.int32, (R, L), 0)
        lane = jax.lax.broadcasted_iota(jnp.int32, (R, L), 1)
        pos = (i * R + row) * L + lane
        valid = pos < hw
        bce_r = jnp.where(valid, bce_r, 0.0)
        inter_r = jnp.where(valid, inter_r, 0.0)

    bce_acc[...] += bce_r
    inter_acc[...] += inter_r

    # Finalize once per batch element: reduce accumulators, write this b's
    # partial into its own (8,128) output tile (lane-dense, layout-legal).
    @pl.when(i == pl.num_programs(1) - 1)
    def _():
        bce_out_ref[...] = jnp.broadcast_to(jnp.sum(bce_acc[...]),
                                            bce_out_ref.shape)
        inter_out_ref[...] = jnp.broadcast_to(jnp.sum(inter_acc[...]),
                                              inter_out_ref.shape)


def dice_bce_loss(logits, targets, epsilon=1e-7, vmem_budget_bytes=16 << 20):
    """logits: (B, C, H, W) float; targets: (B, H, W) int. Returns scalar f32."""
    B, C, H, W = logits.shape
    HW = H * W
    N = B * HW
    L = 128

    # Free reshapes only -- keep native NCHW order, no transpose pass.
    # Upcast happens inside the kernel (halves DMA for bf16 logits).
    x = logits.reshape(B, C, HW)
    t = targets.reshape(B, 1, HW).astype(jnp.int32)

    hw_pad = pl.cdiv(HW, L) * L
    if hw_pad != HW:
        # TODO(synk): for H*W not divisible by 128 a boundary-masked (C, tile)
        # fallback kernel would avoid this (small, <=127-column) padding pass.
        x = jnp.pad(x, ((0, 0), (0, 0), (0, hw_pad - HW)))
        t = jnp.pad(t, ((0, 0), (0, 0), (0, hw_pad - HW)))
    S = hw_pad // L
    x = x.reshape(B, C, S, L)          # lane dim = 128, rows on sublanes
    t = t.reshape(B, 1, S, L)

    # VMEM-budget-derived tile over the row (S) axis.
    itemsize = jnp.dtype(logits.dtype).itemsize
    bytes_per_row = (2 * C * L * itemsize     # logits block, double-buffered
                     + 2 * L * 4              # targets block, double-buffered
                     + 2 * L * 4)             # two f32 accumulators
    tile_r = int(vmem_budget_bytes // bytes_per_row)
    if tile_r >= S:
        tile_r = S                            # full extent (allowed even if <8)
    else:
        tile_r = max(8, (tile_r // 8) * 8)    # multiple of 8 sublanes
    num_tiles = pl.cdiv(S, tile_r)
    needs_mask = (num_tiles * tile_r * L) != HW

    vmem_bytes = (2 * C * tile_r * L * itemsize + 2 * tile_r * L * 4
                  + 2 * tile_r * L * 4 + 4 * 8 * L * 4)
    vmem_limit = int(min(max(2 * vmem_bytes, 32 << 20), 48 << 20))

    kernel = functools.partial(_dice_bce_kernel, hw=HW, needs_mask=needs_mask)

    bce_part, inter_part = pl.pallas_call(
        kernel,
        out_shape=(
            jax.ShapeDtypeStruct((B, 8, L), jnp.float32),
            jax.ShapeDtypeStruct((B, 8, L), jnp.float32),
        ),
        grid_spec=pltpu.PrefetchScalarGridSpec(
            num_scalar_prefetch=0,
            grid=(B, num_tiles),
            in_specs=[
                # kernel sees a (C, tile_r, 128) block per grid step
                pl.BlockSpec((None, C, tile_r, L), lambda b, i: (b, 0, i, 0)),
                pl.BlockSpec((None, 1, tile_r, L), lambda b, i: (b, 0, i, 0)),
            ],
            out_specs=[
                pl.BlockSpec((1, 8, L), lambda b, i: (b, 0, 0)),
                pl.BlockSpec((1, 8, L), lambda b, i: (b, 0, 0)),
            ],
            scratch_shapes=[
                pltpu.VMEM((tile_r, L), jnp.float32),   # bce accumulator
                pltpu.VMEM((tile_r, L), jnp.float32),   # intersection accumulator
            ],
        ),
        compiler_params=pltpu.CompilerParams(
            dimension_semantics=("parallel", "arbitrary"),
            vmem_limit_bytes=vmem_limit),
    )(x, t)

    bce_total = jnp.sum(bce_part[:, 0, 0])
    inter_total = jnp.sum(inter_part[:, 0, 0])

    bce_mean = bce_total / jnp.float32(N * C)
    # union = sum(softmax + one_hot) == 2*N analytically (both sum to 1 over
    # the channel axis), so no kernel work is needed for it.
    union = 2.0 * jnp.float32(N)
    iou = (2.0 * inter_total + epsilon) / (union + epsilon)
    dice = 1.0 - iou
    return dice + bce_mean


def _reference(logits, targets, epsilon=1e-7):
    # pure-JAX reference matching the PyTorch module
    B, C, H, W = logits.shape
    p = jax.nn.softmax(logits.astype(jnp.float32), axis=1)              # (B,C,H,W)
    oh = jax.nn.one_hot(targets.reshape(B, -1), C, dtype=jnp.float32)   # (B,HW,C)
    oh = jnp.transpose(oh, (0, 2, 1)).reshape(B, C, H, W)
    inter = jnp.sum(p * oh)
    union = jnp.sum(p + oh)
    dice = 1.0 - (2.0 * inter + epsilon) / (union + epsilon)
    logp = jnp.maximum(jnp.log(p), -100.0)
    log1mp = jnp.maximum(jnp.log(1.0 - p), -100.0)
    bce = jnp.mean(-(oh * logp + (1.0 - oh) * log1mp))
    return dice + bce


if __name__ == "__main__":
    key = jax.random.PRNGKey(0)
    k1, k2 = jax.random.split(key)
    B, C, H, W = 2, 4, 16, 16
    logits = jax.random.normal(k1, (B, C, H, W), dtype=jnp.float32)
    targets = jax.random.randint(k2, (B, H, W), 0, C, dtype=jnp.int32)

    out = dice_bce_loss(logits, targets)
    out = jax.block_until_ready(out)

    ref = _reference(logits, targets)
    assert jnp.allclose(out, ref, rtol=1e-5, atol=1e-5), (out, ref)
    print("KERNEL_OK")
</pallas_src>

<mosaic_0001>
module attributes {stable_mosaic.version = 11 : i64} {
  func.func @_dice_bce_kernel(%arg0: i32, %arg1: i32, %arg2: memref<1x4x2x128xf32, #tpu.memory_space<vmem>>, %arg3: memref<1x1x2x128xi32, #tpu.memory_space<vmem>>, %arg4: memref<1x8x128xf32, #tpu.memory_space<vmem>>, %arg5: memref<1x8x128xf32, #tpu.memory_space<vmem>>, %arg6: memref<2x128xf32, #tpu.memory_space<vmem>>, %arg7: memref<2x128xf32, #tpu.memory_space<vmem>>) attributes {dimension_semantics = [#tpu.dimension_semantics<parallel>, #tpu.dimension_semantics<arbitrary>], iteration_bounds = array<i64: 2, 1>, scalar_prefetch = 0 : i64, scratch_operands = 2 : i64, tpu.core_type = #tpu.core_type<tc>, window_params = [{transform_indices = @transform_0, window_bounds = array<i64: 1, 4, 2, 128>}, {transform_indices = @transform_1, window_bounds = array<i64: 1, 1, 2, 128>}, {transform_indices = @transform_2, window_bounds = array<i64: 1, 8, 128>}, {transform_indices = @transform_3, window_bounds = array<i64: 1, 8, 128>}]} {
    %c0_i32 = arith.constant 0 : i32
    %0 = arith.cmpi eq, %arg1, %c0_i32 : i32
    %1 = arith.extui %0 : i1 to i32
    %c0_i32_0 = arith.constant 0 : i32
    %2 = arith.cmpi ne, %1, %c0_i32_0 : i32
    scf.if %2 {
      %cst_27 = arith.constant 0.000000e+00 : f32
      %47 = vector.broadcast %cst_27 : f32 to vector<2x128xf32>
      %c0_28 = arith.constant 0 : index
      %c0_29 = arith.constant 0 : index
      %48 = vector.load %arg6[%c0_28, %c0_29] : memref<2x128xf32, #tpu.memory_space<vmem>>, vector<2x128xf32>
      tpu.vector_store %arg6[%c0_28, %c0_29], %47 {strides = array<i32>} : memref<2x128xf32, #tpu.memory_space<vmem>>, vector<2x128xf32>,
      %cst_30 = arith.constant 0.000000e+00 : f32
      %49 = vector.broadcast %cst_30 : f32 to vector<2x128xf32>
      %c0_31 = arith.constant 0 : index
      %c0_32 = arith.constant 0 : index
      %50 = vector.load %arg7[%c0_31, %c0_32] : memref<2x128xf32, #tpu.memory_space<vmem>>, vector<2x128xf32>
      tpu.vector_store %arg7[%c0_31, %c0_32], %49 {strides = array<i32>} : memref<2x128xf32, #tpu.memory_space<vmem>>, vector<2x128xf32>,
    } else {
    }
    %c0 = arith.constant 0 : index
    %c0_1 = arith.constant 0 : index
    %c0_2 = arith.constant 0 : index
    %c0_3 = arith.constant 0 : index
    %3 = vector.load %arg2[%c0, %c0_1, %c0_2, %c0_3] : memref<1x4x2x128xf32, #tpu.memory_space<vmem>>, vector<1x4x2x128xf32>
    %4 = vector.shape_cast %3 : vector<1x4x2x128xf32> to vector<4x2x128xf32>
    %cst = arith.constant dense<0xFF800000> : vector<2x128xf32>
    %5 = vector.multi_reduction <maximumf>, %4, %cst [0] : vector<4x2x128xf32> to vector<2x128xf32>
    %6 = vector.shape_cast %5 : vector<2x128xf32> to vector<1x2x128xf32>
    %7 = vector.broadcast %6 : vector<1x2x128xf32> to vector<4x2x128xf32>
    %8 = arith.subf %4, %7 : vector<4x2x128xf32>
    %9 = math.exp %8 : vector<4x2x128xf32>
    %cst_4 = arith.constant dense<0.000000e+00> : vector<2x128xf32>
    %10 = vector.multi_reduction <add>, %9, %cst_4 [0] : vector<4x2x128xf32> to vector<2x128xf32>
    %11 = vector.shape_cast %10 : vector<2x128xf32> to vector<1x2x128xf32>
    %12 = math.log %11 : vector<1x2x128xf32>
    %13 = vector.broadcast %12 : vector<1x2x128xf32> to vector<4x2x128xf32>
    %14 = arith.subf %8, %13 : vector<4x2x128xf32>
    %cst_5 = arith.constant 1.000000e+00 : f32
    %15 = vector.broadcast %cst_5 : f32 to vector<1x2x128xf32>
    %16 = arith.divf %15, %11 : vector<1x2x128xf32>
    %17 = vector.broadcast %16 : vector<1x2x128xf32> to vector<4x2x128xf32>
    %18 = arith.mulf %9, %17 : vector<4x2x128xf32>
    %c0_6 = arith.constant 0 : index
    %c0_7 = arith.constant 0 : index
    %c0_8 = arith.constant 0 : index
    %c0_9 = arith.constant 0 : index
    %19 = vector.load %arg3[%c0_6, %c0_7, %c0_8, %c0_9] : memref<1x1x2x128xi32, #tpu.memory_space<vmem>>, vector<1x1x2x128xi32>
    %20 = vector.shape_cast %19 : vector<1x1x2x128xi32> to vector<1x2x128xi32>
    %21 = tpu.iota {dimensions = array<i32: 0>} : vector<4x2x128xi32>
    %22 = vector.broadcast %20 : vector<1x2x128xi32> to vector<4x2x128xi32>
    %23 = arith.cmpi eq, %21, %22 : vector<4x2x128xi32>
    %cst_10 = arith.constant -1.000000e+02 : f32
    %24 = vector.broadcast %cst_10 : f32 to vector<4x2x128xf32>
    %25 = arith.maximumf %14, %24 : vector<4x2x128xf32>
    %cst_11 = arith.constant 0.000000e+00 : f32
    %26 = vector.broadcast %cst_11 : f32 to vector<4x2x128xf32>
    %27 = arith.subf %26, %18 : vector<4x2x128xf32>
    %28 = math.log1p %27 : vector<4x2x128xf32>
    %cst_12 = arith.constant -1.000000e+02 : f32
    %29 = vector.broadcast %cst_12 : f32 to vector<4x2x128xf32>
    %30 = arith.maximumf %28, %29 : vector<4x2x128xf32>
    %31 = arith.select %23, %25, %30 : vector<4x2x128xi1>, vector<4x2x128xf32>
    %cst_13 = arith.constant 0.000000e+00 : f32
    %32 = vector.broadcast %cst_13 : f32 to vector<4x2x128xf32>
    %33 = arith.subf %32, %31 : vector<4x2x128xf32>
    %cst_14 = arith.constant 0.000000e+00 : f32
    %34 = vector.broadcast %cst_14 : f32 to vector<4x2x128xf32>
    %35 = arith.select %23, %18, %34 : vector<4x2x128xi1>, vector<4x2x128xf32>
    %cst_15 = arith.constant dense<0.000000e+00> : vector<2x128xf32>
    %36 = vector.multi_reduction <add>, %33, %cst_15 [0] : vector<4x2x128xf32> to vector<2x128xf32>
    %cst_16 = arith.constant dense<0.000000e+00> : vector<2x128xf32>
    %37 = vector.multi_reduction <add>, %35, %cst_16 [0] : vector<4x2x128xf32> to vector<2x128xf32>
    %c0_17 = arith.constant 0 : index
    %c0_18 = arith.constant 0 : index
    %38 = vector.load %arg6[%c0_17, %c0_18] : memref<2x128xf32, #tpu.memory_space<vmem>>, vector<2x128xf32>
    %39 = arith.addf %38, %36 : vector<2x128xf32>
    %c0_19 = arith.constant 0 : index
    %c0_20 = arith.constant 0 : index
    %40 = vector.load %arg6[%c0_19, %c0_20] : memref<2x128xf32, #tpu.memory_space<vmem>>, vector<2x128xf32>
    tpu.vector_store %arg6[%c0_19, %c0_20], %39 {strides = array<i32>} : memref<2x128xf32, #tpu.memory_space<vmem>>, vector<2x128xf32>,
    %c0_21 = arith.constant 0 : index
    %c0_22 = arith.constant 0 : index
    %41 = vector.load %arg7[%c0_21, %c0_22] : memref<2x128xf32, #tpu.memory_space<vmem>>, vector<2x128xf32>
    %42 = arith.addf %41, %37 : vector<2x128xf32>
    %c0_23 = arith.constant 0 : index
    %c0_24 = arith.constant 0 : index
    %43 = vector.load %arg7[%c0_23, %c0_24] : memref<2x128xf32, #tpu.memory_space<vmem>>, vector<2x128xf32>
    tpu.vector_store %arg7[%c0_23, %c0_24], %42 {strides = array<i32>} : memref<2x128xf32, #tpu.memory_space<vmem>>, vector<2x128xf32>,
    %c0_i32_25 = arith.constant 0 : i32
    %44 = arith.cmpi eq, %arg1, %c0_i32_25 : i32
    %45 = arith.extui %44 : i1 to i32
    %c0_i32_26 = arith.constant 0 : i32
    %46 = arith.cmpi ne, %45, %c0_i32_26 : i32
    scf.if %46 {
      %c0_27 = arith.constant 0 : index
      %c0_28 = arith.constant 0 : index
      %47 = vector.load %arg6[%c0_27, %c0_28] : memref<2x128xf32, #tpu.memory_space<vmem>>, vector<2x128xf32>
      %48 = vector.shape_cast %47 : vector<2x128xf32> to vector<1x2x128xf32>
      %cst_29 = arith.constant dense<0.000000e+00> : vector<1xf32>
      %49 = vector.multi_reduction <add>, %48, %cst_29 [1, 2] : vector<1x2x128xf32> to vector<1xf32>
      %50 = vector.shape_cast %49 : vector<1xf32> to vector<1x1x1xf32>
      %51 = vector.extract %50[0, 0, 0] : f32 from vector<1x1x1xf32>
      %52 = vector.broadcast %51 : f32 to vector<1x8x128xf32>
      %c0_30 = arith.constant 0 : index
      %c0_31 = arith.constant 0 : index
      %c0_32 = arith.constant 0 : index
      %53 = vector.load %arg4[%c0_30, %c0_31, %c0_32] : memref<1x8x128xf32, #tpu.memory_space<vmem>>, vector<1x8x128xf32>
      tpu.vector_store %arg4[%c0_30, %c0_31, %c0_32], %52 {strides = array<i32>} : memref<1x8x128xf32, #tpu.memory_space<vmem>>, vector<1x8x128xf32>,
      %c0_33 = arith.constant 0 : index
      %c0_34 = arith.constant 0 : index
      %54 = vector.load %arg7[%c0_33, %c0_34] : memref<2x128xf32, #tpu.memory_space<vmem>>, vector<2x128xf32>
      %55 = vector.shape_cast %54 : vector<2x128xf32> to vector<1x2x128xf32>
      %cst_35 = arith.constant dense<0.000000e+00> : vector<1xf32>
      %56 = vector.multi_reduction <add>, %55, %cst_35 [1, 2] : vector<1x2x128xf32> to vector<1xf32>
      %57 = vector.shape_cast %56 : vector<1xf32> to vector<1x1x1xf32>
      %58 = vector.extract %57[0, 0, 0] : f32 from vector<1x1x1xf32>
      %59 = vector.broadcast %58 : f32 to vector<1x8x128xf32>
      %c0_36 = arith.constant 0 : index
      %c0_37 = arith.constant 0 : index
      %c0_38 = arith.constant 0 : index
      %60 = vector.load %arg5[%c0_36, %c0_37, %c0_38] : memref<1x8x128xf32, #tpu.memory_space<vmem>>, vector<1x8x128xf32>
      tpu.vector_store %arg5[%c0_36, %c0_37, %c0_38], %59 {strides = array<i32>} : memref<1x8x128xf32, #tpu.memory_space<vmem>>, vector<1x8x128xf32>,
    } else {
    }
    return
  }
  func.func @transform_0(%arg0: i32, %arg1: i32) -> (i32, i32, i32, i32) {
    %c0_i32 = arith.constant 0 : i32
    %c0_i32_0 = arith.constant 0 : i32
    %c0_i32_1 = arith.constant 0 : i32
    return %arg0, %c0_i32, %arg1, %c0_i32_0 : i32, i32, i32, i32
  }
  func.func @transform_1(%arg0: i32, %arg1: i32) -> (i32, i32, i32, i32) {
    %c0_i32 = arith.constant 0 : i32
    %c0_i32_0 = arith.constant 0 : i32
    %c0_i32_1 = arith.constant 0 : i32
    return %arg0, %c0_i32, %arg1, %c0_i32_0 : i32, i32, i32, i32
  }
  func.func @transform_2(%arg0: i32, %arg1: i32) -> (i32, i32, i32) {
    %c0_i32 = arith.constant 0 : i32
    %c0_i32_0 = arith.constant 0 : i32
    %c0_i32_1 = arith.constant 0 : i32
    return %arg0, %c0_i32, %c0_i32_0 : i32, i32, i32
  }
  func.func @transform_3(%arg0: i32, %arg1: i32) -> (i32, i32, i32) {
    %c0_i32 = arith.constant 0 : i32
    %c0_i32_0 = arith.constant 0 : i32
    %c0_i32_1 = arith.constant 0 : i32
    return %arg0, %c0_i32, %c0_i32_0 : i32, i32, i32
  }
}

</mosaic_0001>

<bundles_post_ra>
// kernel: tpu_custom_call.1
= control target key start
LH: loop header
LB: loop body
LE: loop exit
PB: predicated region body
PF: predicated region fallthrough
CT: control target
= control target key end

     0   :  { %9 = vsyncpa [#allocation5], 0  ;;  %s1247_s0 = inlined_call_operand.hbm [shape: f32[2,4,2,128], index: 0, kind: input, shape index: {}]   ;;  %s1248_s1 = inlined_call_operand.hbm [shape: s32[2,1,2,128], index: 1, kind: input, shape index: {}]   ;;  %s1249_s2 = inlined_call_operand.hbm [shape: f32[2,8,128], index: 2, kind: output, shape index: {0}]   ;;  %s1250_s3 = inlined_call_operand.hbm [shape: f32[2,8,128], index: 3, kind: output, shape index: {1}]  }
   0x1   :  { %11 = vsyncpa [#allocation5 + $0x1], 0 }
   0x2   :  { %12 = vsyncpa [#allocation8], 0 }
   0x3   :  { %14 = vsyncpa [#allocation8 + $0x1], 0 }
   0x4   :  { %15 = vsyncpa [#allocation6], 0 }
   0x5   :  { %17 = vsyncpa [#allocation6 + $0x1], 0 }
   0x6   :  { %18 = vsyncpa [#allocation11], 0 }
   0x7   :  { %20 = vsyncpa [#allocation11 + $0x1], 0  ;;  %s913_s12 = smov 0   ;;  %s915_s13 = smov 0  }
   0x8   :  { %s917_s14 = smov 0   ;;  %s919_s15 = smov 0  }
   0x9   :  { %s921_s16 = smov 0   ;;  %s923_s17 = smov 0  }
   0xa LB: > { %s586_s18 = sadd.s32 4294967295, %s884_s17   ;;  %s587_s19 = sadd.s32 4294967294, %s884_s17   ;;  %s884_s17 = sphi %s923_s17, %s26_s17   ;;  %s880_s16 = sphi %s921_s16, %s1273_s16   ;;  %s876_s15 = sphi %s919_s15, %s1272_s15   ;;  %s872_s14 = sphi %s917_s14, %s1271_s14   ;;  %s868_s13 = sphi %s915_s13, %s1270_s13   ;;  %s864_s12 = sphi %s913_s12, %s1269_s12  }
   0xb   : > { %s38_s20 = sadd.s32 1, %s880_s16  ;;  %s47_s21 = sadd.s32 1, %s872_s14 }
   0xc   : > { %p40_p0 = scmp.ge.s32.totalorder %s38_s20, 2  ;;  %p54_p1 = scmp.ne.s32.totalorder %s872_s14, %s868_s13 }
   0xd   : > { %p55_p2 = scmp.eq.s32.totalorder %s884_s17, 0  ;;  %p60_p3 = scmp.ne.s32.totalorder %s868_s13, %s864_s12 }
   0xe   : > { %s1275_s20 = smov (%p40_p0, %s38_s20), 0  ;;  %p61_p5 = scmp.eq.s32.totalorder %s586_s18, 0 }
   0xf   : > { %p954_p4 = por %p55_p2, %p54_p1  ;;  %s42_s23 = ssub.s32 %s880_s16, %s1275_s20 }
  0x10   : > { %p112_p6 = scmp.eq.s32.totalorder %s586_s18, 1  ;;  %p45_p7 = scmp.eq.s32.totalorder %s42_s23, 0 }
  0x11   : > { %p960_p8 = por %p61_p5, %p60_p3  ;;  %p118_p10 = scmp.eq.s32.totalorder %s587_s19, 1 }
  0x12   : > { %p964_p9 = por %p112_p6, %p54_p1  ;;  %p633_p13 = scmp.lt.s32.totalorder %s884_s17, 2 }
  0x13   : > { %s1254_s24 = scalar_select %p960_p8, 1, 0 }
  0x14   : > { %s1255_s25 = scalar_select %p964_p9, 1, 0 }
  0x15   : > { %s969_s26 = scalar_select %p45_p7, %s872_s14, %s47_s21  }
  0x16   : > { %p971_p11 = por %p118_p10, %p60_p3  ;;  %s978_s28 = sand.u32 1, %s872_s14  }
  0x17   : > { %s590_s29 = sshll.u32 %s978_s28, 3  ;;  %s606_s30 = sshll.u32 %s880_s16, 7 }
  0x18   : > { %s1256_s27 = scalar_select %p971_p11, 1, 0 }
  0x19   : > { %s985_s6 = scalar_lea.hbm %s1247_s0, %s606_s30  ;;  %s168_s7 = scalar_lea.vmem [#allocation4], %s590_s29 }
  0x1a   : > { %s176_s8 = sshll.u32 %s168_s7, 4  ;;  %p991_p0 = pnand %p633_p13, %p954_p4  ;;  %s987_s8 = int_to_ptr.vmem [resolvable:$true] %s176_s8 }
  0x1b   : > { %s165_s10 = scalar_lea.sflag [#allocation5], %s978_s28  ;;  %s706_s11 = scalar_lea.hbm %s985_s6, 128 }
  0x1c   : > { %p707_p2 = scmp.ne.s32.totalorder %s985_s6, %s706_s11  ;;  %p708_p3 = pneg %p991_p0 }
  0x1d   : > { %s711_s21 = scalar_lea.hbm %s1247_s0, 256  ;;  %p712_p4 = scmp.lt.u32.totalorder %s985_s6, %s1247_s0 }
  0x1e   : > { %p709_p5 = pnand %p708_p3, %p707_p2  ;;  %p713_p7 = scmp.lt.u32.totalorder %s711_s21, %s706_s11 }
  0x1f   : > { %p715_p13 = scmp.lt.u32.totalorder %s706_s11, %s985_s6 }
  0x20   : > { %p710_p6 = pneg %p709_p5  ;;  %p714_p10 = por %p713_p7, %p712_p4 }
  0x22   : > { %p716_p12 = por %p715_p13, %p714_p10 }
  0x24   : > { %p717_p1 = pnand %p716_p12, %p710_p6 }
  0x26   : > { %720 = shalt.err (!%p717_p1)
}
  0x27   : > { %s721_s29 = scalar_lea.vmem %s987_s8, 128  ;;  %s886_s30 = smov [#allocation4]  }
  0x28   : > { %p722_p2 = scmp.ne.s32.totalorder %s987_s8, %s721_s29  ;;  %s726_s4 = sshll.u32 %s886_s30, 4  ;;  %s727_s4 = int_to_ptr.vmem [resolvable:$false] %s726_s4 }
  0x29   : > { %s728_s5 = scalar_lea.vmem %s727_s4, 256  ;;  %p729_p9 = scmp.lt.s32.totalorder %s987_s8, %s727_s4 }
  0x2a   : > { %p724_p5 = pnand %p722_p2, %p708_p3  ;;  %p730_p4 = scmp.lt.s32.totalorder %s728_s5, %s721_s29 }
  0x2c   : > { %p725_p11 = pneg %p724_p5  ;;  %p731_p7 = por %p730_p4, %p729_p9 }
  0x2e   : > { %p732_p10 = pnand %p731_p7, %p725_p11 }
  0x30   : > { %735 = shalt.err (!%p732_p10)
}
  0x31   : > { %s887_s7 = smov 32   ;;  %s888_s11 = smov 2  }
  0x32   : > { %622 = dma.hbm_to_vmem [thread:$0]  (!%p991_p0), %s985_s6, 128, %s987_s8, %s165_s10, %s887_s7, %s887_s7, %s888_s11  }
  0x33   : > { %p203_p12 = scmp.lt.s32.totalorder %s884_s17, 3  ;;  %s593_s18 = sshll.u32 %s978_s28, 1 }
  0x34   : > { %s594_s19 = sshll.u32 %s880_s16, 5  ;;  %p1258_p9 = scmp.ge.s32.totalorder %s884_s17, 1 }
  0x35   : > { %s1036_s29 = scalar_lea.hbm %s1248_s1, %s594_s19  ;;  %s190_s30 = scalar_lea.vmem [#allocation7], %s593_s18 }
  0x36   : > { %p1029_p11 = pnand %p1258_p9, %p203_p12  ;;  %s198_s4 = sshll.u32 %s190_s30, 4  ;;  %s199_s4 = int_to_ptr.vmem [resolvable:$true] %s198_s4 }
  0x37   : > { %s187_s6 = scalar_lea.sflag [#allocation8], %s978_s28  ;;  %s736_s8 = scalar_lea.hbm %s1036_s29, 32 }
  0x38   : > { %s1259_s21 = scalar_select %p1029_p11, 1, 0 }
  0x39   : > { %p737_p1 = scmp.ne.s32.totalorder %s1036_s29, %s736_s8  ;;  %s741_s7 = scalar_lea.hbm %s1248_s1, 64 }
  0x3a   : > { %p742_p2 = scmp.lt.u32.totalorder %s1036_s29, %s1248_s1  ;;  %p743_p5 = scmp.lt.u32.totalorder %s741_s7, %s736_s8 }
  0x3b   : > { %p739_p6 = pnand %p737_p1, %p708_p3  ;;  %p745_p7 = scmp.lt.u32.totalorder %s736_s8, %s1036_s29 }
  0x3c   : > { %p744_p4 = por %p743_p5, %p742_p2 }
  0x3d   : > { %p740_p13 = pneg %p739_p6 }
  0x3e   : > { %p746_p10 = por %p745_p7, %p744_p4 }
  0x40   : > { %p747_p12 = pnand %p746_p10, %p740_p13 }
  0x42   : > { %750 = shalt.err (!%p747_p12)
}
  0x43   : > { %s751_s28 = scalar_lea.vmem %s199_s4, 32  ;;  %s889_s18 = smov [#allocation7]  }
  0x44   : > { %p752_p9 = scmp.ne.s32.totalorder %s199_s4, %s751_s28  ;;  %s756_s22 = sshll.u32 %s889_s18, 4  ;;  %s757_s22 = int_to_ptr.vmem [resolvable:$false] %s756_s22 }
  0x45   : > { %s758_s23 = scalar_lea.vmem %s757_s22, 64  ;;  %p759_p8 = scmp.lt.s32.totalorder %s199_s4, %s757_s22 }
  0x46   : > { %p754_p1 = pnand %p752_p9, %p708_p3  ;;  %p760_p11 = scmp.lt.s32.totalorder %s758_s23, %s751_s28 }
  0x48   : > { %p755_p6 = pneg %p754_p1  ;;  %p761_p2 = por %p760_p11, %p759_p8 }
  0x4a   : > { %p762_p5 = pnand %p761_p2, %p755_p6 }
  0x4c   : > { %765 = shalt.err (!%p762_p5)
}
  0x4d   : > { %625 = dma.hbm_to_vmem [thread:$0]  (!%p991_p0), %s1036_s29, 32, %s199_s4, %s187_s6  }
  0x4e   : > { %p1260_p13 = scmp.ne.s32.totalorder %s1259_s21, 0 }
  0x4f   : > { %s1061_s30 = sand.u32 (!%p1260_p13), 1, %s868_s13   ;;  %p1261_p8 = scmp.ne.s32.totalorder (!%p1260_p13), %s1254_s24, 0 }
  0x50   : > { %207 = sbr.rel (%p1260_p13) target bundleno = 420 (0x1a4), region = 28  ;;  %s1064_s8 = sshll.u32 (!%p1260_p13), %s1061_s30, 3 }
  0x51   : > { %s210_s10 = scalar_lea.sflag (!%p1260_p13), [#allocation5], %s1061_s30  ;;  %s213_s5 = scalar_lea.vmem (!%p1260_p13), [#allocation4], %s1064_s8 }
  0x57   : > { %847 = dma.done.wait (%p1261_p8), %s210_s10, 128  }
  0x58   : > { %849 = vsyncadd (%p1261_p8), %s210_s10, 4294967168  ;;  %s597_s9 = sshll.u32 %s1061_s30, 1  ;;  %s219_s21 = scalar_lea.sflag [#allocation8], %s1061_s30 }
  0x59   : > { %s1074_s29 = scalar_lea.vmem [#allocation7], %s597_s9 }
  0x5a   : > { %851 = dma.done.wait (%p1261_p8), %s219_s21, 32  }
  0x5b   : > { %853 = vsyncadd (%p1261_p8), %s219_s21, 4294967264  ;;  %v890_v0 = vmov 0.0   ;;  %vm265_vm0 = vcmask 1041408   ;;  %v261_v1 = vld [vmem:[%s213_s5] sm:$0x3]  ;;  %s602_s24 = sshll.u32 %s876_s15, 7 }
  0x5c   : > { %259 = vst [vmem:[#allocation2] sm:$0x3] %v890_v0  ;;  %260 = vst [vmem:[#allocation3] sm:$0x3] %v890_v0  ;;  %v262_v2 = vld [vmem:[%s213_s5 + $0x2] sm:$0x3]  ;;  %s1165_s18 = scalar_lea.hbm %s1249_s2, %s602_s24 }
  0x5d   : > { %v263_v3 = vld [vmem:[%s213_s5 + $0x4] sm:$0x3]  ;;  %v264_v4 = vld [vmem:[%s213_s5 + $0x6] sm:$0x3]  ;;  %v266_v5 = vsel %vm265_vm0, %v261_v1, -inf  ;;  %v267_v6 = vsel %vm265_vm0, %v262_v2, -inf }
  0x5e   : > { %v268_v7 = vsel %vm265_vm0, %v263_v3, -inf  ;;  %v269_v8 = vsel %vm265_vm0, %v264_v4, -inf  ;;  %v270_v9 = vmax.f32 %v266_v5, %v267_v6  ;;  %v1101_v39 = vld [vmem:[%s1074_s29] sm:$0x3]  ;;  %s247_s4 = scalar_lea.vmem [#allocation9], %s1064_s8  ;;  %s254_s7 = scalar_lea.vmem [#allocation10], %s1064_s8 }
  0x5f   : > { %v271_v10 = vmax.f32 %v268_v7, %v269_v8  ;;  %vm305_vm1 = vcmp.eq.s32.totalorder %v1101_v39, 0  ;;  %vm306_vm2 = vcmp.eq.s32.totalorder %v1101_v39, 1  ;;  %vm307_vm3 = vcmp.eq.s32.totalorder %v1101_v39, 2  ;;  %s437_s6 = sshll.u32 %s247_s4, 4  ;;  %s450_s11 = sshll.u32 %s254_s7, 4  ;;  %s1167_s6 = int_to_ptr.vmem [resolvable:$true] %s437_s6  ;;  %s1169_s11 = int_to_ptr.vmem [resolvable:$true] %s450_s11 }
  0x60   : > { %vm308_vm4 = vcmp.eq.s32.totalorder %v1101_v39, 3  ;;  %s419_s23 = scalar_lea.sflag [#allocation6], %s1061_s30  ;;  %s766_s10 = scalar_lea.vmem %s1167_s6, 128 }
  0x61   : > { %v272_v11 = vmax.f32 %v270_v9, %v271_v10  ;;  %p767_p0 = scmp.ne.s32.totalorder %s1167_s6, %s766_s10  ;;  %p1266_p3 = scmp.ne.s32.totalorder %s1255_s25, 0 }
  0x62   : > { %s891_s5 = smov [#allocation9]  }
  0x63   : > { %v1084_v12 = vsub.f32 %v261_v1, %v272_v11  ;;  %v1086_v13 = vsub.f32 %v262_v2, %v272_v11  ;;  %v1088_v14 = vsub.f32 %v263_v3, %v272_v11  ;;  %v1090_v15 = vsub.f32 %v264_v4, %v272_v11  ;;  %p768_p11 = pnand %p767_p0, %p1266_p3  ;;  %s770_s9 = sshll.u32 %s891_s5, 4  ;;  %s771_s9 = int_to_ptr.vmem [resolvable:$false] %s770_s9 }
  0x64   : > { %s772_s21 = scalar_lea.vmem %s771_s9, 256  ;;  %p773_p7 = scmp.lt.s32.totalorder %s1167_s6, %s771_s9 }
  0x65   : > { %v277_v16 = vmul.f32 1.442695, %v1084_v12  ;;  %v279_v17 = vmul.f32 1.442695, %v1086_v13  ;;  %v281_v18 = vmul.f32 1.442695, %v1088_v14  ;;  %p769_p4 = pneg %p768_p11  ;;  %p774_p10 = scmp.lt.s32.totalorder %s772_s21, %s766_s10 }
  0x66   : > { %v283_v19 = vmul.f32 1.442695, %v1090_v15 }
  0x67   : > { %686 = vpow2.f32 %v277_v16  ;;  %v386_v16 = vld [vmem:[#allocation3] sm:$0x3]  ;;  %p775_p12 = por %p774_p10, %p773_p7 }
  0x68   : > { %688 = vpow2.f32 %v279_v17 }
  0x69   : > { %690 = vpow2.f32 %v281_v18  ;;  %p776_p9 = pnand %p775_p12, %p769_p4 }
  0x6a   : > { %692 = vpow2.f32 %v283_v19 }
  0x71   : > { %v687_v20 = vpop.eup %686 }
  0x72   : > { %v689_v21 = vpop.eup %688  ;;  %v285_v22 = vsel %vm265_vm0, %v687_v20, 0.0 }
  0x73   : > { %v691_v23 = vpop.eup %690  ;;  %v286_v24 = vsel %vm265_vm0, %v689_v21, 0.0 }
  0x74   : > { %v693_v25 = vpop.eup %692  ;;  %v287_v26 = vadd.f32 %v286_v24, %v285_v22  ;;  %v288_v27 = vsel %vm265_vm0, %v691_v23, 0.0 }
  0x75   : > { %v290_v28 = vsel %vm265_vm0, %v693_v25, 0.0 }
  0x76   : > { %v289_v29 = vadd.f32 %v288_v27, %v287_v26 }
  0x78   : > { %v291_v30 = vadd.f32 %v290_v28, %v289_v29 }
  0x7a   : > { %694 = vrcp.f32 %v291_v30 }
  0x7b   : > { %696 = vlog2.f32 %v291_v30 }
  0x84   : > { %v695_v31 = vpop.eup %694 }
  0x85   : > { %v300_v32 = vmul.f32 %v695_v31, %v687_v20  ;;  %v301_v33 = vmul.f32 %v695_v31, %v689_v21  ;;  %v302_v34 = vmul.f32 %v695_v31, %v691_v23  ;;  %v303_v35 = vmul.f32 %v695_v31, %v693_v25  ;;  %v697_v44 = vpop.eup %696 }
  0x86   : > { %v293_v48 = vmul.f32 0.6931472, %v697_v44 }
  0x87   : > { %v313_v36 = vsub.f32 0.0, %v300_v32  ;;  %v314_v37 = vsub.f32 0.0, %v301_v33  ;;  %v315_v38 = vsub.f32 0.0, %v302_v34  ;;  %v1103_v40 = vsub.f32 0.0, %v303_v35 }
  0x88   : > { %v365_v50 = vsel %vm305_vm1, %v300_v32, 0.0  ;;  %v366_v51 = vsel %vm306_vm2, %v301_v33, 0.0  ;;  %v367_v52 = vsel %vm307_vm3, %v302_v34, 0.0  ;;  %v368_v55 = vsel %vm308_vm4, %v303_v35, 0.0 }
  0x89   : > { %v317_v41 = vadd.f32 1.0, %v313_v36  ;;  %v326_v42 = vadd.f32 1.0, %v314_v37  ;;  %v335_v43 = vadd.f32 1.0, %v315_v38  ;;  %v320_v45 = vmul.f32 -0.5, %v313_v36 }
  0x8a   : > { %v329_v46 = vmul.f32 -0.5, %v314_v37  ;;  %v344_v47 = vadd.f32 1.0, %v1103_v40  ;;  %v338_v49 = vmul.f32 -0.5, %v315_v38  ;;  %v347_v54 = vmul.f32 -0.5, %v1103_v40 }
  0x8b   : > { %698 = vlog2.f32 %v317_v41  ;;  %v321_v53 = vadd.f32 1.0, %v320_v45  ;;  %v376_v56 = vsel %vm265_vm0, %v365_v50, 0.0  ;;  %v323_v57 = vand.u32 2147483647, %v313_v36 }
  0x8c   : > { %700 = vlog2.f32 %v326_v42  ;;  %v330_v58 = vadd.f32 1.0, %v329_v46  ;;  %v377_v59 = vsel %vm265_vm0, %v366_v51, 0.0  ;;  %v379_v60 = vsel %vm265_vm0, %v367_v52, 0.0 }
  0x8d   : > { %702 = vlog2.f32 %v335_v43  ;;  %v332_v61 = vand.u32 2147483647, %v314_v37  ;;  %v339_v62 = vadd.f32 1.0, %v338_v49  ;;  %v378_v63 = vadd.f32 %v377_v59, %v376_v56 }
  0x8e   : > { %704 = vlog2.f32 %v344_v47  ;;  %v294_v0 = vsub.f32 %v1084_v12, %v293_v48  ;;  %v295_v1 = vsub.f32 %v1086_v13, %v293_v48  ;;  %v341_v2 = vand.u32 2147483647, %v315_v38 }
  0x8f   : > { %v381_v3 = vsel %vm265_vm0, %v368_v55, 0.0  ;;  %v296_v4 = vsub.f32 %v1088_v14, %v293_v48  ;;  %v322_v5 = vmul.f32 %v321_v53, %v313_v36  ;;  %v348_v6 = vadd.f32 1.0, %v347_v54  ;;  %v383_v53 = vld [vmem:[#allocation2] sm:$0x3] }
  0x90   : > { %v380_v7 = vadd.f32 %v379_v60, %v378_v63  ;;  %v297_v9 = vsub.f32 %v1090_v15, %v293_v48  ;;  %vm1127_vm5 = vcmp.lt.f32.partialorder %v323_v57, 0.0004427343  ;;  %v331_v11 = vmul.f32 %v330_v58, %v314_v37 }
  0x91   : > { %v350_v12 = vand.u32 2147483647, %v1103_v40  ;;  %vm1132_vm6 = vcmp.lt.f32.partialorder %v332_v61, 0.0004427343  ;;  %v340_v14 = vmul.f32 %v339_v62, %v315_v38  ;;  %v309_v21 = vmax.f32 %v294_v0, -100.0 }
  0x92   : > { %v382_v19 = vadd.f32 %v381_v3, %v380_v7  ;;  %v310_v22 = vmax.f32 %v295_v1, -100.0  ;;  %vm342_vm7 = vcmp.lt.f32.partialorder %v341_v2, 0.0004427343  ;;  %v349_v25 = vmul.f32 %v348_v6, %v1103_v40 }
  0x93   : > { %v311_v28 = vmax.f32 %v296_v4, -100.0  ;;  %vm351_vm8 = vcmp.lt.f32.partialorder %v350_v12, 0.0004427343  ;;  %v312_v34 = vmax.f32 %v297_v9, -100.0 }
  0x94   : > { %v387_v26 = vadd.f32 %v386_v16, %v382_v19 }
  0x95   : > { %v699_v8 = vpop.eup %698 }
  0x96   : > { %v701_v13 = vpop.eup %700  ;;  %v319_v17 = vmul.f32 0.6931472, %v699_v8  ;;  %388 = vst [vmem:[#allocation3] sm:$0x3] %v387_v26 }
  0x97   : > { %v703_v20 = vpop.eup %702  ;;  %v328_v15 = vmul.f32 0.6931472, %v701_v13 }
  0x98   : > { %v325_v23 = vsel %vm1127_vm5, %v322_v5, %v319_v17  ;;  %v337_v24 = vmul.f32 0.6931472, %v703_v20  ;;  %v705_v27 = vpop.eup %704 }
  0x99   : > { %v334_v29 = vsel %vm1132_vm6, %v331_v11, %v328_v15  ;;  %v353_v30 = vmax.f32 %v325_v23, -100.0  ;;  %v346_v32 = vmul.f32 0.6931472, %v705_v27 }
  0x9a   : > { %v343_v31 = vsel %vm342_vm7, %v340_v14, %v337_v24  ;;  %v354_v33 = vmax.f32 %v334_v29, -100.0 }
  0x9b   : > { %v355_v35 = vmax.f32 %v343_v31, -100.0  ;;  %v357_v36 = vsel %vm305_vm1, %v309_v21, %v353_v30  ;;  %v352_v37 = vsel %vm351_vm8, %v349_v25, %v346_v32 }
  0x9c   : > { %v358_v38 = vsel %vm306_vm2, %v310_v22, %v354_v33  ;;  %v361_v40 = vsub.f32 0.0, %v357_v36  ;;  %v356_v41 = vmax.f32 %v352_v37, -100.0 }
  0x9d   : > { %v359_v42 = vsel %vm307_vm3, %v311_v28, %v355_v35  ;;  %v362_v43 = vsub.f32 0.0, %v358_v38  ;;  %v405_v57 = vld [vmem:[#allocation3] sm:$0x3] }
  0x9e   : > { %v363_v44 = vsub.f32 0.0, %v359_v42  ;;  %v369_v45 = vsel %vm265_vm0, %v361_v40, 0.0  ;;  %v360_v46 = vsel %vm308_vm4, %v312_v34, %v356_v41  ;;  %v406_v39 = vsel %vm265_vm0, %v405_v57, 0.0 }
  0x9f   : > { %v370_v47 = vsel %vm265_vm0, %v362_v43, 0.0  ;;  %v364_v48 = vsub.f32 0.0, %v360_v46 }
  0xa0   : > { %v371_v49 = vadd.f32 %v370_v47, %v369_v45  ;;  %v372_v50 = vsel %vm265_vm0, %v363_v44, 0.0 }
  0xa1   : > { %v374_v52 = vsel %vm265_vm0, %v364_v48, 0.0 }
  0xa2   : > { %v373_v51 = vadd.f32 %v372_v50, %v371_v49 }
  0xa4   : > { %v375_v54 = vadd.f32 %v374_v52, %v373_v51 }
  0xa6   : > { %v384_v55 = vadd.f32 %v383_v53, %v375_v54 }
  0xa8   : > { %385 = vst [vmem:[#allocation2] sm:$0x3] %v384_v55 }
  0xaf   : > { %v392_v56 = vld [vmem:[#allocation2] sm:$0x3] }
  0xb0   : > { %v393_v58 = vsel %vm265_vm0, %v392_v56, 0.0 }
  0xb1   : > { %394 = vadd.xlane.f32.xlu0 %v393_v58 }
  0xb5   : > { %407 = vadd.xlane.f32.xlu0 %v406_v39 }
 0x13e   : > { %v395_v59 = vpop.xlane.xlu0 %394 }
 0x13f   : > { %v396_v60 = vrot.slane %v395_v59, 4 }
 0x141   : > { %v397_v61 = vadd.f32 %v396_v60, %v395_v59 }
 0x142   : > { %v408_v62 = vpop.xlane.xlu0 %407 }
 0x143   : > { %v398_v63 = vrot.slane %v397_v61, 2  ;;  %v409_v0 = vrot.slane %v408_v62, 4 }
 0x145   : > { %v410_v1 = vadd.f32 %v409_v0, %v408_v62  ;;  %v399_v2 = vadd.f32 %v398_v63, %v397_v61 }
 0x147   : > { %v411_v3 = vrot.slane %v410_v1, 2  ;;  %v400_v4 = vrot.slane %v399_v2, 1 }
 0x149   : > { %v412_v5 = vadd.f32 %v411_v3, %v410_v1  ;;  %v401_v6 = vadd.f32 %v400_v4, %v399_v2 }
 0x14b   : > { %607 = vpush %v401_v6  ;;  %v413_v7 = vrot.slane %v412_v5, 1 }
 0x14d   : > { %v414_v8 = vadd.f32 %v413_v7, %v412_v5 }
 0x14f   : > { %609 = vpush %v414_v8 }
 0x17c   : > { %s608_s22 = spop %607 }
 0x17d   : > { %v403_v9 = vstv %s608_s22 }
 0x17e   : > { %404 = vst [vmem:[%s247_s4] sm:$0xff] %v403_v9 }
 0x17f   : > { %779 = shalt.err (!%p776_p9)
}
 0x180   : > { %s780_s29 = scalar_lea.hbm %s1165_s18, 128  ;;  %s784_s28 = scalar_lea.hbm %s1249_s2, 256 }
 0x181   : > { %p781_p1 = scmp.ne.s32.totalorder %s1165_s18, %s780_s29  ;;  %p785_p5 = scmp.lt.u32.totalorder %s1165_s18, %s1249_s2 }
 0x182   : > { %p786_p13 = scmp.lt.u32.totalorder %s784_s28, %s780_s29  ;;  %p788_p0 = scmp.lt.u32.totalorder %s780_s29, %s1165_s18 }
 0x183   : > { %p782_p6 = pnand %p781_p1, %p1266_p3 }
 0x184   : > { %p787_p8 = por %p786_p13, %p785_p5 }
 0x185   : > { %p783_p2 = pneg %p782_p6 }
 0x186   : > { %p789_p11 = por %p788_p0, %p787_p8 }
 0x188   : > { %p790_p4 = pnand %p789_p11, %p783_p2 }
 0x18a   : > { %793 = shalt.err (!%p790_p4)
}
 0x18b   : > { %615 = dma.vmem_to_hbm [thread:$0]  (%p1266_p3), %s1167_s6, 128, %s1165_s18, %s419_s23  }
 0x18c   : > { %s610_s10 = spop %609  ;;  %s1198_s29 = scalar_lea.hbm %s1250_s3, %s602_s24 }
 0x18d   : > { %v416_v10 = vstv %s610_s10  ;;  %s424_s4 = scalar_lea.sflag [#allocation11], %s1061_s30  ;;  %s794_s19 = scalar_lea.vmem %s1169_s11, 128 }
 0x18e   : > { %417 = vst [vmem:[%s254_s7] sm:$0xff] %v416_v10  ;;  %p795_p7 = scmp.ne.s32.totalorder %s1169_s11, %s794_s19  ;;  %s892_s28 = smov [#allocation10]  }
 0x18f   : > { %s798_s22 = sshll.u32 %s892_s28, 4  ;;  %s799_s22 = int_to_ptr.vmem [resolvable:$false] %s798_s22 }
 0x190   : > { %p796_p10 = pnand %p795_p7, %p1266_p3  ;;  %s800_s6 = scalar_lea.vmem %s799_s22, 256 }
 0x191   : > { %p801_p9 = scmp.lt.s32.totalorder %s1169_s11, %s799_s22  ;;  %p802_p1 = scmp.lt.s32.totalorder %s800_s6, %s794_s19 }
 0x192   : > { %p797_p12 = pneg %p796_p10 }
 0x193   : > { %p803_p6 = por %p802_p1, %p801_p9 }
 0x195   : > { %p804_p2 = pnand %p803_p6, %p797_p12 }
 0x197   : > { %807 = shalt.err (!%p804_p2)
}
 0x198   : > { %s808_s15 = scalar_lea.hbm %s1198_s29, 128  ;;  %s812_s24 = scalar_lea.hbm %s1250_s3, 256 }
 0x199   : > { %p809_p5 = scmp.ne.s32.totalorder %s1198_s29, %s808_s15  ;;  %p813_p0 = scmp.lt.u32.totalorder %s1198_s29, %s1250_s3 }
 0x19a   : > { %p814_p11 = scmp.lt.u32.totalorder %s812_s24, %s808_s15  ;;  %p816_p7 = scmp.lt.u32.totalorder %s808_s15, %s1198_s29 }
 0x19b   : > { %p810_p13 = pnand %p809_p5, %p1266_p3 }
 0x19c   : > { %p815_p4 = por %p814_p11, %p813_p0 }
 0x19d   : > { %p811_p8 = pneg %p810_p13 }
 0x19e   : > { %p817_p10 = por %p816_p7, %p815_p4 }
 0x1a0   : > { %p818_p12 = pnand %p817_p10, %p811_p8 }
 0x1a2   : > { %821 = shalt.err (!%p818_p12)
}
 0x1a3   : > { %616 = dma.vmem_to_hbm [thread:$0]  (%p1266_p3), %s1169_s11, 128, %s1198_s29, %s424_s4  }
 0x1a4 PF: > { %s462_s23 = sand.u32 1, %s864_s12   ;;  %p1267_p9 = scmp.ne.s32.totalorder %s1256_s27, 0 }
 0x1a5   : > { %p1268_p1 = scmp.ge.s32.totalorder %s884_s17, 2  ;;  %s463_s5 = scalar_lea.sflag [#allocation6], %s462_s23 }
 0x1a7   : > { %p627_p6 = pnand %p1268_p1, %p1267_p9 }
 0x1a9   : > { %855 = dma.done.wait (!%p627_p6), %s463_s5, 128  }
 0x1aa   : > { %857 = vsyncadd (!%p627_p6), %s463_s5, 4294967168  ;;  %s472_s10 = scalar_lea.sflag [#allocation11], %s462_s23 }
 0x1ab   : > { %859 = dma.done.wait (!%p627_p6), %s472_s10, 128  }
 0x1ac   : > { %861 = vsyncadd (!%p627_p6), %s472_s10, 4294967168  ;;  %s26_s17 = sadd.s32 1, %s884_s17   ;;  %s1269_s12 = smov %s868_s13 }
 0x1ad   : > { %p23_p2 = scmp.ge.s32.totalorder %s26_s17, 4   ;;  %s1270_s13 = smov %s872_s14 }
 0x1ae   : > { %s1271_s14 = smov %s969_s26  ;;  %s1272_s15 = smov %s880_s16 }
 0x1af   : > { %s1273_s16 = smov %s1275_s20  ;;  %25 = sbr.rel (!%p23_p2) target bundleno = 10 (0xa), region = 111 }
 0x1b6   :  { %477 = vsyncpa [#allocation5], 1 }
 0x1b7   :  { %479 = vsyncpa [#allocation5 + $0x1], 1 }
 0x1b8   :  { %480 = vsyncpa [#allocation8], 1 }
 0x1b9   :  { %482 = vsyncpa [#allocation8 + $0x1], 1 }
 0x1ba   :  { %483 = vsyncpa [#allocation6], 1 }
 0x1bb   :  { %485 = vsyncpa [#allocation6 + $0x1], 1 }
 0x1bc   :  { %486 = vsyncpa [#allocation11], 1 }
 0x1bd   :  { %488 = vsyncpa [#allocation11 + $0x1], 1 }

</bundles_post_ra>
